<compile_context>
chip_gen: v5e
topology: v5e:2x2
jax: 0.10.0
libtpu: 0.0.40
codegen_flags: <defaults>
</compile_context>

<pallas_src>
import numpy as np
import jax
import jax.numpy as jnp
from jax import lax
from jax.experimental import pallas as pl
from jax.experimental.pallas import tpu as pltpu


T_TILE = 256  # triplet-axis tile: lane-dense, multiple of 256 (v6e/v7x MXU)


def _make_triplet_loss_kernel(t_count, t_tile, n):
    """Build the kernel with static triplet count / tile size / N baked in."""
    inv_t = np.float32(1.0 / float(t_count))

    def kernel(x_ref, idx_ref, o_ref, dist_ref):
        t = pl.program_id(0)

        # ---- once per call: squared pairwise distances into VMEM scratch ----
        @pl.when(t == 0)
        def _():
            xb = x_ref[...]                                    # (N, d) bf16
            xf = xb.astype(jnp.float32)
            xn = jnp.sum(xf * xf, axis=1, keepdims=True)       # (N, 1) f32
            gram = lax.dot_general(                            # bf16 MXU, f32 acc
                xb, xb,
                dimension_numbers=(((1,), (1,)), ((), ())),
                preferred_element_type=jnp.float32)
            # clamp BEFORE the gather (matches pairwise_distances + clamp).
            dist_ref[...] = jnp.maximum(xn + xn.T - 2.0 * gram, 0.0)
            o_ref[...] = jnp.zeros_like(o_ref)

        dist = dist_ref[...]                                   # (N, N) f32

        # ---- this tile's triplet indices, lane-dense along T ----
        idx = idx_ref[...]                                     # (3, T_TILE) i32
        idx_i = idx[0:1, :]                                    # (1, T_TILE)
        idx_j = idx[1:2, :]
        idx_k = idx[2:3, :]

        # (N,1) sublane iota; broadcasts against the (1,T_TILE) index rows —
        # no (N,T_TILE) int32 iota temp is materialized.
        row_iota = lax.broadcasted_iota(jnp.int32, (n, 1), 0)
        sel_i = (row_iota == idx_i).astype(jnp.float32)        # (N, T_TILE)
        # Fused j/k selector: +1 at row j, -1 at row k, 0 elsewhere.
        e_diff = jnp.where(
            row_iota == idx_j, jnp.float32(1.0),
            jnp.where(row_iota == idx_k, jnp.float32(-1.0), jnp.float32(0.0)))

        # rowsT[n, t] = dist[n, i_t] == dist[i_t, n] (dist symmetric); one MXU
        # matmul gathers all needed rows for this tile.  Kept f32 so the
        # clamped distances are not re-rounded before the subtraction.
        rowsT = jnp.dot(dist, sel_i, preferred_element_type=jnp.float32)

        # d_diff[t] = D[i_t, j_t] - D[i_t, k_t]  (sublane reduction).
        d_diff = jnp.sum(rowsT * e_diff, axis=0, keepdims=True)  # (1, T_TILE)

        # Stable softplus: log(1+exp(z)) = max(z,0) + log(1 + exp(-|z|)).
        loss_t = (jnp.maximum(d_diff, 0.0)
                  + jnp.log(1.0 + jnp.exp(-jnp.abs(d_diff))))

        # Mask padded triplet columns using the global column index (tiny
        # (1,T_TILE) compare), then accumulate the scaled tile sum.
        col = t * t_tile + lax.broadcasted_iota(jnp.int32, (1, t_tile), 1)
        loss_t = jnp.where(col < t_count, loss_t, 0.0)
        o_ref[...] += jnp.sum(loss_t, axis=1, keepdims=True) * inv_t

    return kernel


def get_triplets(n1, n2, rng):
    """Same logic as TripletLoss.__get_triplet (deterministic via `rng`)."""
    triplets = []
    labels = list(range(n1)) + list(range(n2))
    for i in range(len(labels)):
        triplets_i = []
        for j in range(len(labels)):
            if labels[i] == labels[j] and i != j:
                for k in range(len(labels)):
                    if labels[i] != labels[k]:
                        triplets_i.append([i, j, k])
        rng.shuffle(triplets_i)
        triplets += triplets_i[:3]
    assert triplets and len(triplets) < 2000
    return triplets


def pack_triplet_indices(triplets, t_tile=T_TILE):
    """Host-side (cacheable) packing of triplets into a tile-padded i32 array."""
    tri = np.asarray(triplets, dtype=np.int32)               # (T, 3)
    t_count = int(tri.shape[0])
    t_pad = ((t_count + t_tile - 1) // t_tile) * t_tile      # multiple of 256
    idx = np.zeros((3, t_pad), dtype=np.int32)               # padded cols -> 0,
    idx[:, :t_count] = tri.T                                  # masked in-kernel
    return jnp.asarray(idx), t_count, t_pad


def triplet_loss_forward(mod_img1, img2, triplets):
    """Pallas implementation of TripletLoss.forward (pre_layer=None)."""
    # bf16 features: halves the only HBM->VMEM DMA that scales with d and puts
    # the Gram matmul on the native bf16 MXU path (f32 accumulation).
    x = jnp.concatenate([mod_img1, img2], axis=0).astype(jnp.bfloat16)  # (N, d)
    n, d = x.shape
    idx, t_count, t_pad = pack_triplet_indices(triplets, T_TILE)
    num_tiles = t_pad // T_TILE

    kernel = _make_triplet_loss_kernel(t_count, T_TILE, n)

    # Real per-step VMEM footprint: resident x (double-buffered bf16), streamed
    # idx blocks (double-buffered), dist scratch, and the (N, T_TILE) selector /
    # gather temps.  2x margin, floor 16 MiB, capped under v7x physical VMEM.
    est = (2 * n * d * 2 + 2 * 3 * T_TILE * 4 + n * n * 4
           + 4 * n * T_TILE * 4)
    vmem_limit = int(min(max(2 * est + (4 << 20), 16 << 20), 60 << 20))

    cost = pl.CostEstimate(
        flops=2 * n * n * d + 2 * n * n * t_pad + 8 * n * t_pad,
        transcendentals=2 * t_pad,
        bytes_accessed=n * d * 2 + 3 * t_pad * 4 + 4,
    )

    out = pl.pallas_call(
        kernel,
        out_shape=jax.ShapeDtypeStruct((1, 1), jnp.float32),
        grid_spec=pltpu.PrefetchScalarGridSpec(
            num_scalar_prefetch=0,
            grid=(num_tiles,),
            in_specs=[
                pl.BlockSpec((n, d), lambda t: (0, 0)),        # x resident
                pl.BlockSpec((3, T_TILE), lambda t: (0, t)),   # idx streamed
            ],
            out_specs=pl.BlockSpec((1, 1), lambda t: (0, 0)),  # resident acc
            scratch_shapes=[pltpu.VMEM((n, n), jnp.float32)],  # dist
        ),
        compiler_params=pltpu.CompilerParams(
            dimension_semantics=("arbitrary",),
            vmem_limit_bytes=vmem_limit,
        ),
        cost_estimate=cost,
    )(x, idx)
    return out[0, 0]


def _reference_loss_from_features(x, triplets):
    """Numpy reference matching MyTripletLossFunc.forward on features x."""
    x = np.asarray(x, dtype=np.float32)
    xn = (x ** 2).sum(1)
    dist = xn[:, None] + xn[None, :] - 2.0 * (x @ x.T)
    dist = np.clip(dist, 0.0, np.inf)
    loss = 0.0
    for i, j, k in triplets:
        z = np.float64(dist[i, j]) - np.float64(dist[i, k])
        loss += np.log(1.0 + np.exp(z))
    return np.float32(loss / len(triplets))


if __name__ == "__main__":
    # Small deterministic example: batch=4 embeddings of dim 32 (N=8).
    B, D = 4, 32
    key = jax.random.PRNGKey(0)
    k1, k2 = jax.random.split(key)
    mod_img1 = jax.random.normal(k1, (B, D), dtype=jnp.float32)
    img2 = jax.random.normal(k2, (B, D), dtype=jnp.float32)

    rng = np.random.RandomState(0)  # deterministic triplet shuffling
    triplets = get_triplets(B, B, rng)

    loss = triplet_loss_forward(mod_img1, img2, triplets)
    loss = jax.block_until_ready(loss)

    # Reference uses the same bf16-rounded features the kernel feeds the MXU
    # (per perf review: bf16 Gram inputs, f32 accumulation).  The only
    # deviation from the f32 PyTorch path is this input rounding.
    x_bf16 = np.asarray(
        jnp.concatenate([mod_img1, img2], axis=0)
        .astype(jnp.bfloat16).astype(jnp.float32))
    ref = _reference_loss_from_features(x_bf16, triplets)
    assert np.allclose(np.asarray(loss), ref, rtol=1e-3, atol=1e-3), (loss, ref)

    print("KERNEL_OK")
</pallas_src>

<mosaic_0001>
module attributes {stable_mosaic.version = 11 : i64} {
  func.func @kernel(%arg0: i32, %arg1: memref<8x32xbf16, #tpu.memory_space<vmem>>, %arg2: memref<3x256xi32, #tpu.memory_space<vmem>>, %arg3: memref<1x1xf32, #tpu.memory_space<vmem>>, %arg4: memref<8x8xf32, #tpu.memory_space<vmem>>) attributes {dimension_semantics = [#tpu.dimension_semantics<arbitrary>], iteration_bounds = array<i64: 1>, scalar_prefetch = 0 : i64, scratch_operands = 1 : i64, tpu.core_type = #tpu.core_type<tc>, window_params = [{pipeline_mode = #tpu.pipeline_mode<synchronous>, transform_indices = @transform_0, window_bounds = array<i64: 8, 32>}, {transform_indices = @transform_1, window_bounds = array<i64: 3, 256>}, {pipeline_mode = #tpu.pipeline_mode<synchronous>, transform_indices = @transform_2, window_bounds = array<i64: 1, 1>}]} {
    %c0_i32 = arith.constant 0 : i32
    %0 = arith.cmpi eq, %arg0, %c0_i32 : i32
    %1 = arith.extui %0 : i1 to i32
    %c0_i32_0 = arith.constant 0 : i32
    %2 = arith.cmpi ne, %1, %c0_i32_0 : i32
    scf.if %2 {
      %c0_18 = arith.constant 0 : index
      %c0_19 = arith.constant 0 : index
      %54 = vector.load %arg1[%c0_18, %c0_19] : memref<8x32xbf16, #tpu.memory_space<vmem>>, vector<8x32xbf16>
      %55 = arith.extf %54 : vector<8x32xbf16> to vector<8x32xf32>
      %56 = arith.mulf %55, %55 : vector<8x32xf32>
      %cst_20 = arith.constant dense<0.000000e+00> : vector<8xf32>
      %57 = vector.multi_reduction <add>, %56, %cst_20 [1] : vector<8x32xf32> to vector<8xf32>
      %58 = vector.shape_cast %57 : vector<8xf32> to vector<8x1xf32>
      %cst_21 = arith.constant dense<0.000000e+00> : vector<8x8xf32>
      %59 = tpu.matmul %54, %54, %cst_21 {dimension_numbers = #tpu.dot_dimension_numbers<[1], [1], [0], [0], [0, 0, 1, 0], [], []>} : vector<8x32xbf16>, vector<8x32xbf16>, vector<8x8xf32> -> vector<8x8xf32>
      %60 = tpu.transpose %58, [1, 0] : vector<8x1xf32> -> vector<1x8xf32>
      %61 = vector.broadcast %58 : vector<8x1xf32> to vector<8x8xf32>
      %62 = vector.broadcast %60 : vector<1x8xf32> to vector<8x8xf32>
      %63 = arith.addf %61, %62 : vector<8x8xf32>
      %cst_22 = arith.constant 2.000000e+00 : f32
      %64 = vector.broadcast %cst_22 : f32 to vector<8x8xf32>
      %65 = arith.mulf %64, %59 : vector<8x8xf32>
      %66 = arith.subf %63, %65 : vector<8x8xf32>
      %cst_23 = arith.constant 0.000000e+00 : f32
      %67 = vector.broadcast %cst_23 : f32 to vector<8x8xf32>
      %68 = arith.maximumf %66, %67 : vector<8x8xf32>
      %c0_24 = arith.constant 0 : index
      %c0_25 = arith.constant 0 : index
      %69 = vector.load %arg4[%c0_24, %c0_25] : memref<8x8xf32, #tpu.memory_space<vmem>>, vector<8x8xf32>
      tpu.vector_store %arg4[%c0_24, %c0_25], %68 {strides = array<i32>} : memref<8x8xf32, #tpu.memory_space<vmem>>, vector<8x8xf32>,
      %cst_26 = arith.constant 0.000000e+00 : f32
      %70 = vector.broadcast %cst_26 : f32 to vector<1x1xf32>
      %c0_27 = arith.constant 0 : index
      %c0_28 = arith.constant 0 : index
      %71 = vector.load %arg3[%c0_27, %c0_28] : memref<1x1xf32, #tpu.memory_space<vmem>>, vector<1x1xf32>
      tpu.vector_store %arg3[%c0_27, %c0_28], %70 {strides = array<i32>} : memref<1x1xf32, #tpu.memory_space<vmem>>, vector<1x1xf32>,
    } else {
    }
    %c0 = arith.constant 0 : index
    %c0_1 = arith.constant 0 : index
    %3 = vector.load %arg4[%c0, %c0_1] : memref<8x8xf32, #tpu.memory_space<vmem>>, vector<8x8xf32>
    %c0_2 = arith.constant 0 : index
    %c0_3 = arith.constant 0 : index
    %4 = vector.load %arg2[%c0_2, %c0_3] : memref<3x256xi32, #tpu.memory_space<vmem>>, vector<3x256xi32>
    %5 = vector.extract_strided_slice %4 {offsets = [0, 0], sizes = [1, 256], strides = [1, 1]} : vector<3x256xi32> to vector<1x256xi32>
    %6 = vector.extract_strided_slice %4 {offsets = [1, 0], sizes = [1, 256], strides = [1, 1]} : vector<3x256xi32> to vector<1x256xi32>
    %7 = vector.extract_strided_slice %4 {offsets = [2, 0], sizes = [1, 256], strides = [1, 1]} : vector<3x256xi32> to vector<1x256xi32>
    %8 = tpu.iota {dimensions = array<i32: 0>} : vector<8x1xi32>
    %9 = vector.broadcast %8 : vector<8x1xi32> to vector<8x256xi32>
    %10 = vector.broadcast %5 : vector<1x256xi32> to vector<8x256xi32>
    %11 = arith.cmpi eq, %9, %10 : vector<8x256xi32>
    %12 = arith.extui %11 : vector<8x256xi1> to vector<8x256xi32>
    %13 = arith.sitofp %12 : vector<8x256xi32> to vector<8x256xf32>
    %14 = vector.broadcast %8 : vector<8x1xi32> to vector<8x256xi32>
    %15 = vector.broadcast %6 : vector<1x256xi32> to vector<8x256xi32>
    %16 = arith.cmpi eq, %14, %15 : vector<8x256xi32>
    %17 = vector.broadcast %8 : vector<8x1xi32> to vector<8x256xi32>
    %18 = vector.broadcast %7 : vector<1x256xi32> to vector<8x256xi32>
    %19 = arith.cmpi eq, %17, %18 : vector<8x256xi32>
    %cst = arith.constant -1.000000e+00 : f32
    %cst_4 = arith.constant 0.000000e+00 : f32
    %20 = vector.broadcast %cst : f32 to vector<8x256xf32>
    %21 = vector.broadcast %cst_4 : f32 to vector<8x256xf32>
    %22 = arith.select %19, %20, %21 : vector<8x256xi1>, vector<8x256xf32>
    %cst_5 = arith.constant 1.000000e+00 : f32
    %23 = vector.broadcast %cst_5 : f32 to vector<8x256xf32>
    %24 = arith.select %16, %23, %22 : vector<8x256xi1>, vector<8x256xf32>
    %cst_6 = arith.constant dense<0.000000e+00> : vector<8x256xf32>
    %25 = tpu.matmul %3, %13, %cst_6 {dimension_numbers = #tpu.dot_dimension_numbers<[1], [0], [0], [1], [0, 0, 1, 1], [], []>} : vector<8x8xf32>, vector<8x256xf32>, vector<8x256xf32> -> vector<8x256xf32>
    %26 = arith.mulf %25, %24 : vector<8x256xf32>
    %cst_7 = arith.constant dense<0.000000e+00> : vector<256xf32>
    %27 = vector.multi_reduction <add>, %26, %cst_7 [0] : vector<8x256xf32> to vector<256xf32>
    %28 = vector.shape_cast %27 : vector<256xf32> to vector<1x256xf32>
    %cst_8 = arith.constant 0.000000e+00 : f32
    %29 = vector.broadcast %cst_8 : f32 to vector<1x256xf32>
    %30 = arith.maximumf %28, %29 : vector<1x256xf32>
    %31 = math.absf %28 : vector<1x256xf32>
    %cst_9 = arith.constant 0.000000e+00 : f32
    %32 = vector.broadcast %cst_9 : f32 to vector<1x256xf32>
    %33 = arith.subf %32, %31 : vector<1x256xf32>
    %34 = math.exp %33 : vector<1x256xf32>
    %cst_10 = arith.constant 1.000000e+00 : f32
    %35 = vector.broadcast %cst_10 : f32 to vector<1x256xf32>
    %36 = arith.addf %35, %34 : vector<1x256xf32>
    %37 = math.log %36 : vector<1x256xf32>
    %38 = arith.addf %30, %37 : vector<1x256xf32>
    %c256_i32 = arith.constant 256 : i32
    %39 = arith.muli %arg0, %c256_i32 : i32
    %40 = tpu.iota {dimensions = array<i32: 1>} : vector<1x256xi32>
    %41 = vector.broadcast %39 : i32 to vector<1x256xi32>
    %42 = arith.addi %41, %40 : vector<1x256xi32>
    %c24_i32 = arith.constant 24 : i32
    %43 = vector.broadcast %c24_i32 : i32 to vector<1x256xi32>
    %44 = arith.cmpi slt, %42, %43 : vector<1x256xi32>
    %cst_11 = arith.constant 0.000000e+00 : f32
    %45 = vector.broadcast %cst_11 : f32 to vector<1x256xf32>
    %46 = arith.select %44, %38, %45 : vector<1x256xi1>, vector<1x256xf32>
    %c0_12 = arith.constant 0 : index
    %c0_13 = arith.constant 0 : index
    %47 = vector.load %arg3[%c0_12, %c0_13] : memref<1x1xf32, #tpu.memory_space<vmem>>, vector<1x1xf32>
    %cst_14 = arith.constant dense<0.000000e+00> : vector<1xf32>
    %48 = vector.multi_reduction <add>, %46, %cst_14 [1] : vector<1x256xf32> to vector<1xf32>
    %49 = vector.shape_cast %48 : vector<1xf32> to vector<1x1xf32>
    %cst_15 = arith.constant 0.0416666679 : f32
    %50 = vector.broadcast %cst_15 : f32 to vector<1x1xf32>
    %51 = arith.mulf %49, %50 : vector<1x1xf32>
    %52 = arith.addf %47, %51 : vector<1x1xf32>
    %c0_16 = arith.constant 0 : index
    %c0_17 = arith.constant 0 : index
    %53 = vector.load %arg3[%c0_16, %c0_17] : memref<1x1xf32, #tpu.memory_space<vmem>>, vector<1x1xf32>
    tpu.vector_store %arg3[%c0_16, %c0_17], %52 {strides = array<i32>} : memref<1x1xf32, #tpu.memory_space<vmem>>, vector<1x1xf32>,
    return
  }
  func.func @transform_0(%arg0: i32) -> (i32, i32) {
    %c0_i32 = arith.constant 0 : i32
    %c0_i32_0 = arith.constant 0 : i32
    %c0_i32_1 = arith.constant 0 : i32
    return %c0_i32, %c0_i32_0 : i32, i32
  }
  func.func @transform_1(%arg0: i32) -> (i32, i32) {
    %c0_i32 = arith.constant 0 : i32
    %c0_i32_0 = arith.constant 0 : i32
    return %c0_i32, %arg0 : i32, i32
  }
  func.func @transform_2(%arg0: i32) -> (i32, i32) {
    %c0_i32 = arith.constant 0 : i32
    %c0_i32_0 = arith.constant 0 : i32
    %c0_i32_1 = arith.constant 0 : i32
    return %c0_i32, %c0_i32_0 : i32, i32
  }
}

</mosaic_0001>

<bundles_post_ra>
// kernel: tpu_custom_call.1
= control target key start
LH: loop header
LB: loop body
LE: loop exit
PB: predicated region body
PF: predicated region fallthrough
CT: control target
= control target key end

     0   :  { %7 = vsyncpa [#allocation4], 0  ;;  %s377_s0 = inlined_call_operand.hbm [shape: bf16[8,32], index: 0, kind: input, shape index: {}]   ;;  %s378_s1 = inlined_call_operand.hbm [shape: s32[3,256], index: 1, kind: input, shape index: {}]   ;;  %s379_s2 = inlined_call_operand.hbm [shape: f32[1,1], index: 2, kind: output, shape index: {}]  }
   0x1   :  { %8 = vsyncpa [#allocation7], 0 }
   0x2   :  { %9 = vsyncpa [#allocation5], 0  ;;  %s15_s11 = sshll.u32 %s377_s0, 4  ;;  %s346_s12 = smov [#allocation3]   ;;  %s16_s11 = int_to_ptr.hbm [resolvable:$true] %s15_s11 }
   0x3   :  { %s17_s13 = sshll.u32 %s346_s12, 4  ;;  %s26_s16 = sshll.u32 %s378_s1, 4  ;;  %s18_s13 = int_to_ptr.vmem [resolvable:$true] %s17_s13  ;;  %s27_s16 = int_to_ptr.hbm [resolvable:$true] %s26_s16 }
   0x4   :  { %20 = dma.hbm_to_vmem [thread:$0]  %s16_s11, 64, %s18_s13, [#allocation4]  }
   0x5   :  { %s347_s17 = smov [#allocation6]  }
   0x6   :  { %s28_s18 = sshll.u32 %s347_s17, 4  ;;  %s29_s18 = int_to_ptr.vmem [resolvable:$true] %s28_s18 }
   0x7   :  { %31 = dma.hbm_to_vmem [thread:$0]  %s27_s16, 128, %s29_s18, [#allocation7]  }
   0x8   :  { %340 = dma.done.wait [#allocation4], 64  }
   0x9   :  { %341 = vsyncadd [#allocation4], 4294967232 }
   0xa   :  { %342 = dma.done.wait [#allocation7], 128  }
   0xb   :  { %343 = vsyncadd [#allocation7], 4294967168  ;;  %v45_v0 = vld [vmem:[#allocation3] sm:$0xf]  ;;  %vm48_vm0 = vcmask 261120   ;;  %v111_v9 = vlaneseq  ;;  %v348_v15 = vmov 1.0  }
   0xc   :  { %v46_v1 = vunpack.c.l.bf16 %v45_v0  ;;  %v53_v4 = vsel %vm48_vm0, %v45_v0, 0  ;;  %v110_v8 = vld [vmem:[#allocation6] sm:$0x77]  ;;  %vm107_vm3 = vcmask 0   ;;  %v349_v18 = vmov 0.0   ;;  %s350_s0 = smov [#allocation8]  }
   0xd   :  { %62 = vmatpush.bf16.xpose.msra.mxu0 %v53_v4  ;;  %v113_v10 = vperm.slane %v110_v8, 0  ;;  %v114_v11 = vperm.slane %v110_v8, 4  ;;  %v112_v12 = vshrl.u32 %v111_v9, 7  ;;  %v123_v16 = vperm.slane %v110_v8, 1  ;;  %108 = vst.msk [vmem:[#allocation8] sm:$0x1] %vm107_vm3, %v349_v18 }
   0xe   :  { %v47_v2 = vmul.f32 %v46_v1, %v46_v1  ;;  %v129_v17 = vperm.slane %v110_v8, 2  ;;  %vm105_vm6 = vcmask 64512   ;;  %v217_v44 = vand.u32 127, %v111_v9  ;;  %s239_s1 = sshll.u32 %s350_s0, 4  ;;  %s241_s21 = sshll.u32 %s379_s2, 4  ;;  %s240_s1 = int_to_ptr.vmem [resolvable:$true] %s239_s1  ;;  %s242_s21 = int_to_ptr.hbm [resolvable:$true] %s241_s21 }
   0xf   :  { %v115_v13 = vperm.slane %v113_v10, 0  ;;  %v116_v14 = vperm.slane %v114_v11, 0  ;;  %v125_v19 = vperm.slane %v123_v16, 1 }
  0x10   :  { %v49_v3 = vsel %vm48_vm0, %v47_v2, 0.0  ;;  %v131_v20 = vperm.slane %v129_v17, 2  ;;  %vm222_vm7 = vcmp.lt.s32.totalorder %v217_v44, 24 }
  0x11   :  { %50 = vadd.xlane.f32.xlu0 %v49_v3  ;;  %vm117_vm1 = vcmp.eq.s32.totalorder %v112_v12, %v115_v13  ;;  %vm118_vm2 = vcmp.eq.s32.totalorder %v112_v12, %v116_v14  ;;  %vm127_vm4 = vcmp.eq.s32.totalorder %v112_v12, %v125_v19 }
  0x12   :  { %255 = vmatpush.msk.msra.mxu1 %vm117_vm1, %v348_v15  ;;  %257 = vmatpush.msk.msra.mxu2 %vm118_vm2, %v348_v15  ;;  %vm133_vm5 = vcmp.eq.s32.totalorder %v112_v12, %v131_v20 }
  0x13   :  { %v135_v21 = vsel %vm133_vm5, -1.0, %v349_v18 }
  0x14   :  { %252 = vmatmul.msk.bf16.vlgmr.msra.gmra.mxu0 %vm48_vm0, %v45_v0  ;;  %v137_v22 = vsel %vm127_vm4, 1.0, %v135_v21  ;;  %v226_v50 = vld [vmem:[#allocation8] sm:$0x1] }
  0x84   :  { %v51_v5 = vpop.xlane.xlu0 %50 }
  0x85   :  { %68 = vxpose.xlu0.b32.start.end [1/1] (short) (narrow) %v51_v5, 8 }
  0x91   :  { %v64_v6 = vpop.f32.mrf.mxu0 }
  0x92   :  { %v102_v24 = vmul.f32 2.0, %v64_v6 }
  0x99   :  { %v66_v7 = vpop.f32.mrf.mxu0 }
 0x129   :  { %v84_v23 = vpop.trf.xlu0 }
 0x12a   :  { %v100_v25 = vperm.slane %v84_v23, 0 }
 0x12c   :  { %v101_v26 = vadd.f32 %v100_v25, %v51_v5 }
 0x12e   :  { %v103_v27 = vsub.f32 %v101_v26, %v102_v24 }
 0x130   :  { %v104_v28 = vmax.f32 %v103_v27, 0.0 }
 0x132   :  { %106 = vst.msk [vmem:[#allocation2] sm:$0xff] %vm105_vm6, %v104_v28 }
 0x139   :  { %v109_v29 = vld [vmem:[#allocation2] sm:$0xff] }
 0x13a   :  { %256 = vmatmul.msk.f32.vlgmr.msra.gmra.mxu1 %vm105_vm6, %v109_v29  ;;  %258 = vmatmul.msk.f32.vlgmr.msra.gmra.mxu2 %vm105_vm6, %v109_v29 }
 0x1b7   :  { %v160_v30 = vpop.f32.mrf.mxu1 }
 0x1b8   :  { %v183_v31 = vmul.f32 %v160_v30, %v137_v22 }
 0x1ba   :  { %v185_v32 = vrot.slane %v183_v31, 4 }
 0x1bc   :  { %v186_v33 = vadd.f32 %v185_v32, %v183_v31 }
 0x1bd   :  { %v180_v34 = vpop.f32.mrf.mxu2 }
 0x1be   :  { %v187_v35 = vrot.slane %v186_v33, 2 }
 0x1c0   :  { %v188_v36 = vadd.f32 %v187_v35, %v186_v33 }
 0x1c2   :  { %v189_v37 = vrot.slane %v188_v36, 1 }
 0x1c4   :  { %v190_v38 = vadd.f32 %v189_v37, %v188_v36 }
 0x1c6   :  { %v199_v39 = vand.u32 2147483647, %v190_v38  ;;  %v197_v46 = vmax.f32 %v190_v38, 0.0 }
 0x1c8   :  { %v201_v40 = vsub.f32 0.0, %v199_v39 }
 0x1ca   :  { %v203_v41 = vmul.f32 1.442695, %v201_v40 }
 0x1cc   :  { %264 = vpow2.f32 %v203_v41 }
 0x1d2   :  { %v265_v42 = vpop.eup %264 }
 0x1d3   :  { %v207_v43 = vadd.f32 1.0, %v265_v42 }
 0x1d5   :  { %266 = vlog2.f32 %v207_v43 }
 0x1db   :  { %v267_v45 = vpop.eup %266 }
 0x1dc   :  { %v210_v47 = vmul.f32 0.6931472, %v267_v45 }
 0x1de   :  { %v213_v48 = vadd.f32 %v210_v47, %v197_v46 }
 0x1e0   :  { %v224_v49 = vsel %vm222_vm7, %v213_v48, 0.0 }
 0x1e1   :  { %228 = vadd.xlane.f32.xlu1 %v224_v49 }
 0x254   :  { %v229_v51 = vpop.xlane.xlu1 %228 }
 0x255   :  { %v230_v52 = vmul.f32 0.041666668, %v229_v51 }
 0x257   :  { %v231_v53 = vadd.f32 %v230_v52, %v226_v50 }
 0x259   :  { %233 = vst.msk [vmem:[#allocation8] sm:$0x1] %vm107_vm3, %v231_v53 }
 0x25a   :  { %244 = dma.vmem_to_hbm [thread:$0]  %s240_s1, 16, %s242_s21, [#allocation5]  }
 0x25b   :  { %344 = dma.done.wait [#allocation5], 16  }
 0x25c   :  { %345 = vsyncadd [#allocation5], 4294967280 }
 0x25d   :  { %249 = vsyncpa [#allocation4], 1 }
 0x25e   :  { %250 = vsyncpa [#allocation7], 1 }
 0x25f   :  { %251 = vsyncpa [#allocation5], 1 }

</bundles_post_ra>
